<compile_context>
chip_gen: v6e
topology: v6e:2x2x1
jax: 0.10.0
libtpu: 0.0.40
codegen_flags: <defaults>
</compile_context>

<pallas_src>
import functools

import jax
import jax.numpy as jnp
import numpy as np
from jax.experimental import pallas as pl
from jax.experimental.pallas import tpu as pltpu

EPS = 1e-5


def _double_conv_kernel(x_ref, wb1_ref, wb2_ref, g1_ref, b1_ref, g2_ref,
                        b2_ref, sel_ref, o_ref, *, H, inv_count):
    """Whole DoubleConv block, lane-dense, fully in VMEM.

    x_ref   : (N*H, W*Cin)            f32   input activations
    wb1_ref : (3, W*Cin,  W*Cout)     f32   block-banded conv1 weights (per dy)
    wb2_ref : (3, W*Cout, W*Cout)     f32   block-banded conv2 weights (per dy)
    g*/b*   : (1, W*Cout)             f32   pre-tiled BN gamma / beta
    sel_ref : (W*Cout, W*Cout)        f32   channel-sum / broadcast matrix
    o_ref   : (N*H, W*Cout)           f32
    """

    def conv3x3_banded(inp, wb_ref):
        nh, k = inp.shape
        hh = jax.lax.broadcasted_iota(jnp.int32, (nh, k), 0) % H
        # dy = 0 (center row)
        acc = jnp.dot(inp, wb_ref[1], preferred_element_type=jnp.float32)
        # dy = -1 : tap[r] = inp[r-1]; rows with h == 0 see zero padding.
        up = jnp.where(hh >= 1, jnp.roll(inp, 1, axis=0), 0.0)
        acc = acc + jnp.dot(up, wb_ref[0], preferred_element_type=jnp.float32)
        # dy = +1 : tap[r] = inp[r+1]; rows with h == H-1 see zero padding.
        dn = jnp.where(hh <= H - 2, jnp.roll(inp, -1, axis=0), 0.0)
        acc = acc + jnp.dot(dn, wb_ref[2], preferred_element_type=jnp.float32)
        return acc

    sel = sel_ref[...]

    def bn_relu(y, g_b, b_b):
        # Single-pass batch statistics (sum, sum of squares).  Row reduction is
        # a cross-sublane reduce; the strided per-channel reduction across the
        # W pixel groups (and the broadcast back to all lanes) is one tiny
        # matmul against `sel`.
        s1 = jnp.sum(y, axis=0, keepdims=True)            # (1, W*Cout)
        s2 = jnp.sum(y * y, axis=0, keepdims=True)        # (1, W*Cout)
        mean = jnp.dot(s1, sel, preferred_element_type=jnp.float32) * inv_count
        ex2 = jnp.dot(s2, sel, preferred_element_type=jnp.float32) * inv_count
        var = ex2 - mean * mean
        scale = jax.lax.rsqrt(var + EPS) * g_b
        shift = b_b - mean * scale
        return jnp.maximum(y * scale + shift, 0.0)

    h1 = bn_relu(conv3x3_banded(x_ref[...], wb1_ref), g1_ref[...], b1_ref[...])
    h2 = bn_relu(conv3x3_banded(h1, wb2_ref), g2_ref[...], b2_ref[...])
    o_ref[...] = h2


def double_conv(x_nchw, w1_oihw, g1, b1, w2_oihw, g2, b2):
    """PyTorch-compatible wrapper: NCHW in, NCHW out."""
    x = jnp.transpose(x_nchw, (0, 2, 3, 1)).astype(jnp.float32)      # NHWC
    N, H, W, Cin = x.shape
    Cout = w1_oihw.shape[0]

    w1 = jnp.transpose(w1_oihw, (2, 3, 1, 0)).astype(jnp.float32)    # HWIO
    w2 = jnp.transpose(w2_oihw, (2, 3, 1, 0)).astype(jnp.float32)    # HWIO

    # Fold the dx taps of the 3x3 kernel into a block-banded matrix so each
    # conv row-tap is a single lane-dense matmul:
    #   wb[ky, x*Cin + i, x2*Cout + o] = w[ky, (x - x2) + 1, i, o]  (|x-x2|<=1)
    def banded(w_hwio):
        kh, kw, ci, co = w_hwio.shape
        d = np.zeros((kw, W, W), np.float32)
        for k in range(kw):
            for xx in range(W):
                x2 = xx - (k - 1)
                if 0 <= x2 < W:
                    d[k, xx, x2] = 1.0
        wb = jnp.einsum("kxy,tkio->txiyo", jnp.asarray(d), w_hwio)
        return wb.reshape(kh, W * ci, W * co)

    wb1 = banded(w1)                                   # (3, W*Cin,  W*Cout)
    wb2 = banded(w2)                                   # (3, W*Cout, W*Cout)

    # Channel-selection matrix: sel[a, b] = 1 iff a % Cout == b % Cout.
    sel = jnp.asarray(np.tile(np.eye(Cout, dtype=np.float32), (W, W)))

    # Pre-tiled (lane-dense) gamma / beta: lane w*Cout + c -> value[c].
    def tile_c(v):
        return jnp.tile(v.astype(jnp.float32).reshape(1, Cout), (1, W))

    g1b, b1b = tile_c(g1), tile_c(b1)
    g2b, b2b = tile_c(g2), tile_c(b2)

    x2d = x.reshape(N * H, W * Cin)

    kernel = functools.partial(
        _double_conv_kernel, H=H, inv_count=1.0 / float(N * H * W))
    vmem = pl.BlockSpec(memory_space=pltpu.MemorySpace.VMEM)

    out2d = pl.pallas_call(
        kernel,
        out_shape=jax.ShapeDtypeStruct((N * H, W * Cout), jnp.float32),
        in_specs=[vmem] * 8,
        out_specs=vmem,
    )(x2d, wb1, wb2, g1b, b1b, g2b, b2b, sel)

    out = out2d.reshape(N, H, W, Cout)
    return jnp.transpose(out, (0, 3, 1, 2))                          # NCHW


def _reference(x_nchw, w1_oihw, g1, b1, w2_oihw, g2, b2):
    """Pure-JAX reference (matches PyTorch DoubleConv forward, training-mode BN)."""
    x = jnp.transpose(x_nchw, (0, 2, 3, 1))
    w1 = jnp.transpose(w1_oihw, (2, 3, 1, 0))
    w2 = jnp.transpose(w2_oihw, (2, 3, 1, 0))

    def conv(h, w):
        return jax.lax.conv_general_dilated(
            h, w, window_strides=(1, 1), padding="SAME",
            dimension_numbers=("NHWC", "HWIO", "NHWC"))

    def bn_relu(h, g, b):
        mean = h.mean(axis=(0, 1, 2), keepdims=True)
        var = ((h - mean) ** 2).mean(axis=(0, 1, 2), keepdims=True)
        return jnp.maximum((h - mean) * jax.lax.rsqrt(var + EPS) * g + b, 0.0)

    h = bn_relu(conv(x, w1), g1, b1)
    h = bn_relu(conv(h, w2), g2, b2)
    return jnp.transpose(h, (0, 3, 1, 2))


if __name__ == "__main__":
    # Small shapes consistent with DoubleConv(in_channels=4, out_channels=8).
    N, Cin, Cout, H, W = 2, 4, 8, 16, 16

    key = jax.random.PRNGKey(0)
    kx, kw1, kw2 = jax.random.split(key, 3)

    x = jax.random.normal(kx, (N, Cin, H, W), jnp.float32)            # NCHW
    # Conv2d weights (OIHW, bias=False), deterministic synthetic init.
    w1 = 0.1 * jax.random.normal(kw1, (Cout, Cin, 3, 3), jnp.float32)
    w2 = 0.1 * jax.random.normal(kw2, (Cout, Cout, 3, 3), jnp.float32)
    # BatchNorm2d params at PyTorch init: gamma=1, beta=0.
    g1 = jnp.ones((Cout,), jnp.float32)
    b1 = jnp.zeros((Cout,), jnp.float32)
    g2 = jnp.ones((Cout,), jnp.float32)
    b2 = jnp.zeros((Cout,), jnp.float32)

    out = double_conv(x, w1, g1, b1, w2, g2, b2)
    out = jax.block_until_ready(out)

    ref = jax.block_until_ready(_reference(x, w1, g1, b1, w2, g2, b2))
    assert out.shape == (N, Cout, H, W)
    np.testing.assert_allclose(np.asarray(out), np.asarray(ref),
                               rtol=1e-4, atol=1e-4)
    print("KERNEL_OK")
</pallas_src>

<mosaic_0001>
module attributes {stable_mosaic.version = 11 : i64} {
  func.func @_double_conv_kernel(%arg0: memref<32x64xf32, #tpu.memory_space<vmem>>, %arg1: memref<3x64x128xf32, #tpu.memory_space<vmem>>, %arg2: memref<3x128x128xf32, #tpu.memory_space<vmem>>, %arg3: memref<1x128xf32, #tpu.memory_space<vmem>>, %arg4: memref<1x128xf32, #tpu.memory_space<vmem>>, %arg5: memref<1x128xf32, #tpu.memory_space<vmem>>, %arg6: memref<1x128xf32, #tpu.memory_space<vmem>>, %arg7: memref<128x128xf32, #tpu.memory_space<vmem>>, %arg8: memref<32x128xf32, #tpu.memory_space<vmem>>) attributes {dimension_semantics = [], scalar_prefetch = 0 : i64, scratch_operands = 0 : i64, tpu.core_type = #tpu.core_type<tc>} {
    %c0 = arith.constant 0 : index
    %c0_0 = arith.constant 0 : index
    %0 = vector.load %arg7[%c0, %c0_0] : memref<128x128xf32, #tpu.memory_space<vmem>>, vector<128x128xf32>
    %c0_1 = arith.constant 0 : index
    %c0_2 = arith.constant 0 : index
    %1 = vector.load %arg0[%c0_1, %c0_2] : memref<32x64xf32, #tpu.memory_space<vmem>>, vector<32x64xf32>
    %2 = tpu.iota {dimensions = array<i32: 0>} : vector<32x64xi32>
    %c16_i32 = arith.constant 16 : i32
    %c0_i32 = arith.constant 0 : i32
    %3 = arith.cmpi eq, %c16_i32, %c0_i32 : i32
    %c1_i32 = arith.constant 1 : i32
    %4 = arith.select %3, %c1_i32, %c16_i32 : i32
    %5 = vector.broadcast %4 : i32 to vector<32x64xi32>
    %6 = arith.remsi %2, %5 : vector<32x64xi32>
    %c0_i32_3 = arith.constant 0 : i32
    %7 = vector.broadcast %c0_i32_3 : i32 to vector<32x64xi32>
    %8 = arith.cmpi ne, %6, %7 : vector<32x64xi32>
    %c0_i32_4 = arith.constant 0 : i32
    %9 = vector.broadcast %c0_i32_4 : i32 to vector<32x64xi32>
    %10 = arith.cmpi slt, %6, %9 : vector<32x64xi32>
    %c0_i32_5 = arith.constant 0 : i32
    %11 = arith.cmpi slt, %4, %c0_i32_5 : i32
    %12 = vector.broadcast %11 : i1 to vector<32x64xi1>
    %13 = vector.broadcast %12 : vector<32x64xi1> to vector<32x64xi1>
    %14 = arith.xori %10, %13 : vector<32x64xi1>
    %15 = arith.andi %14, %8 : vector<32x64xi1>
    %16 = vector.broadcast %4 : i32 to vector<32x64xi32>
    %17 = arith.addi %6, %16 : vector<32x64xi32>
    %18 = arith.select %15, %17, %6 : vector<32x64xi1>, vector<32x64xi32>
    %c1 = arith.constant 1 : index
    %c0_6 = arith.constant 0 : index
    %c0_7 = arith.constant 0 : index
    %19 = vector.load %arg1[%c1, %c0_6, %c0_7] : memref<3x64x128xf32, #tpu.memory_space<vmem>>, vector<1x64x128xf32>
    %20 = vector.shape_cast %19 : vector<1x64x128xf32> to vector<64x128xf32>
    %cst = arith.constant dense<0.000000e+00> : vector<32x128xf32>
    %21 = tpu.matmul %1, %20, %cst {dimension_numbers = #tpu.dot_dimension_numbers<[1], [0], [0], [1], [0, 0, 1, 1], [], []>} : vector<32x64xf32>, vector<64x128xf32>, vector<32x128xf32> -> vector<32x128xf32>
    %c1_i32_8 = arith.constant 1 : i32
    %22 = vector.broadcast %c1_i32_8 : i32 to vector<32x64xi32>
    %23 = arith.cmpi sge, %18, %22 : vector<32x64xi32>
    %24 = vector.extract_strided_slice %1 {offsets = [31, 0], sizes = [1, 64], strides = [1, 1]} : vector<32x64xf32> to vector<1x64xf32>
    %25 = vector.extract_strided_slice %1 {offsets = [0, 0], sizes = [31, 64], strides = [1, 1]} : vector<32x64xf32> to vector<31x64xf32>
    %26 = tpu.concatenate %24, %25 in 0 : vector<1x64xf32>, vector<31x64xf32> -> vector<32x64xf32>
    %cst_9 = arith.constant 0.000000e+00 : f32
    %27 = vector.broadcast %cst_9 : f32 to vector<32x64xf32>
    %28 = arith.select %23, %26, %27 : vector<32x64xi1>, vector<32x64xf32>
    %c0_10 = arith.constant 0 : index
    %c0_11 = arith.constant 0 : index
    %c0_12 = arith.constant 0 : index
    %29 = vector.load %arg1[%c0_10, %c0_11, %c0_12] : memref<3x64x128xf32, #tpu.memory_space<vmem>>, vector<1x64x128xf32>
    %30 = vector.shape_cast %29 : vector<1x64x128xf32> to vector<64x128xf32>
    %cst_13 = arith.constant dense<0.000000e+00> : vector<32x128xf32>
    %31 = tpu.matmul %28, %30, %cst_13 {dimension_numbers = #tpu.dot_dimension_numbers<[1], [0], [0], [1], [0, 0, 1, 1], [], []>} : vector<32x64xf32>, vector<64x128xf32>, vector<32x128xf32> -> vector<32x128xf32>
    %32 = arith.addf %21, %31 : vector<32x128xf32>
    %c14_i32 = arith.constant 14 : i32
    %33 = vector.broadcast %c14_i32 : i32 to vector<32x64xi32>
    %34 = arith.cmpi sle, %18, %33 : vector<32x64xi32>
    %35 = vector.extract_strided_slice %1 {offsets = [1, 0], sizes = [31, 64], strides = [1, 1]} : vector<32x64xf32> to vector<31x64xf32>
    %36 = vector.extract_strided_slice %1 {offsets = [0, 0], sizes = [1, 64], strides = [1, 1]} : vector<32x64xf32> to vector<1x64xf32>
    %37 = tpu.concatenate %35, %36 in 0 : vector<31x64xf32>, vector<1x64xf32> -> vector<32x64xf32>
    %cst_14 = arith.constant 0.000000e+00 : f32
    %38 = vector.broadcast %cst_14 : f32 to vector<32x64xf32>
    %39 = arith.select %34, %37, %38 : vector<32x64xi1>, vector<32x64xf32>
    %c2 = arith.constant 2 : index
    %c0_15 = arith.constant 0 : index
    %c0_16 = arith.constant 0 : index
    %40 = vector.load %arg1[%c2, %c0_15, %c0_16] : memref<3x64x128xf32, #tpu.memory_space<vmem>>, vector<1x64x128xf32>
    %41 = vector.shape_cast %40 : vector<1x64x128xf32> to vector<64x128xf32>
    %cst_17 = arith.constant dense<0.000000e+00> : vector<32x128xf32>
    %42 = tpu.matmul %39, %41, %cst_17 {dimension_numbers = #tpu.dot_dimension_numbers<[1], [0], [0], [1], [0, 0, 1, 1], [], []>} : vector<32x64xf32>, vector<64x128xf32>, vector<32x128xf32> -> vector<32x128xf32>
    %43 = arith.addf %32, %42 : vector<32x128xf32>
    %c0_18 = arith.constant 0 : index
    %c0_19 = arith.constant 0 : index
    %44 = vector.load %arg3[%c0_18, %c0_19] : memref<1x128xf32, #tpu.memory_space<vmem>>, vector<1x128xf32>
    %c0_20 = arith.constant 0 : index
    %c0_21 = arith.constant 0 : index
    %45 = vector.load %arg4[%c0_20, %c0_21] : memref<1x128xf32, #tpu.memory_space<vmem>>, vector<1x128xf32>
    %cst_22 = arith.constant dense<0.000000e+00> : vector<128xf32>
    %46 = vector.multi_reduction <add>, %43, %cst_22 [0] : vector<32x128xf32> to vector<128xf32>
    %47 = vector.shape_cast %46 : vector<128xf32> to vector<1x128xf32>
    %48 = arith.mulf %43, %43 : vector<32x128xf32>
    %cst_23 = arith.constant dense<0.000000e+00> : vector<128xf32>
    %49 = vector.multi_reduction <add>, %48, %cst_23 [0] : vector<32x128xf32> to vector<128xf32>
    %50 = vector.shape_cast %49 : vector<128xf32> to vector<1x128xf32>
    %cst_24 = arith.constant dense<0.000000e+00> : vector<1x128xf32>
    %51 = tpu.matmul %47, %0, %cst_24 {dimension_numbers = #tpu.dot_dimension_numbers<[1], [0], [0], [1], [0, 0, 1, 1], [], []>} : vector<1x128xf32>, vector<128x128xf32>, vector<1x128xf32> -> vector<1x128xf32>
    %cst_25 = arith.constant 0.001953125 : f32
    %52 = vector.broadcast %cst_25 : f32 to vector<1x128xf32>
    %53 = arith.mulf %51, %52 : vector<1x128xf32>
    %cst_26 = arith.constant dense<0.000000e+00> : vector<1x128xf32>
    %54 = tpu.matmul %50, %0, %cst_26 {dimension_numbers = #tpu.dot_dimension_numbers<[1], [0], [0], [1], [0, 0, 1, 1], [], []>} : vector<1x128xf32>, vector<128x128xf32>, vector<1x128xf32> -> vector<1x128xf32>
    %cst_27 = arith.constant 0.001953125 : f32
    %55 = vector.broadcast %cst_27 : f32 to vector<1x128xf32>
    %56 = arith.mulf %54, %55 : vector<1x128xf32>
    %57 = arith.mulf %53, %53 : vector<1x128xf32>
    %58 = arith.subf %56, %57 : vector<1x128xf32>
    %cst_28 = arith.constant 9.99999974E-6 : f32
    %59 = vector.broadcast %cst_28 : f32 to vector<1x128xf32>
    %60 = arith.addf %58, %59 : vector<1x128xf32>
    %61 = math.rsqrt %60 : vector<1x128xf32>
    %62 = arith.mulf %61, %44 : vector<1x128xf32>
    %63 = arith.mulf %53, %62 : vector<1x128xf32>
    %64 = arith.subf %45, %63 : vector<1x128xf32>
    %65 = vector.broadcast %62 : vector<1x128xf32> to vector<32x128xf32>
    %66 = arith.mulf %43, %65 : vector<32x128xf32>
    %67 = vector.broadcast %64 : vector<1x128xf32> to vector<32x128xf32>
    %68 = arith.addf %66, %67 : vector<32x128xf32>
    %cst_29 = arith.constant 0.000000e+00 : f32
    %69 = vector.broadcast %cst_29 : f32 to vector<32x128xf32>
    %70 = arith.maximumf %68, %69 : vector<32x128xf32>
    %71 = tpu.iota {dimensions = array<i32: 0>} : vector<32x128xi32>
    %c16_i32_30 = arith.constant 16 : i32
    %c0_i32_31 = arith.constant 0 : i32
    %72 = arith.cmpi eq, %c16_i32_30, %c0_i32_31 : i32
    %c1_i32_32 = arith.constant 1 : i32
    %73 = arith.select %72, %c1_i32_32, %c16_i32_30 : i32
    %74 = vector.broadcast %73 : i32 to vector<32x128xi32>
    %75 = arith.remsi %71, %74 : vector<32x128xi32>
    %c0_i32_33 = arith.constant 0 : i32
    %76 = vector.broadcast %c0_i32_33 : i32 to vector<32x128xi32>
    %77 = arith.cmpi ne, %75, %76 : vector<32x128xi32>
    %c0_i32_34 = arith.constant 0 : i32
    %78 = vector.broadcast %c0_i32_34 : i32 to vector<32x128xi32>
    %79 = arith.cmpi slt, %75, %78 : vector<32x128xi32>
    %c0_i32_35 = arith.constant 0 : i32
    %80 = arith.cmpi slt, %73, %c0_i32_35 : i32
    %81 = vector.broadcast %80 : i1 to vector<32x128xi1>
    %82 = vector.broadcast %81 : vector<32x128xi1> to vector<32x128xi1>
    %83 = arith.xori %79, %82 : vector<32x128xi1>
    %84 = arith.andi %83, %77 : vector<32x128xi1>
    %85 = vector.broadcast %73 : i32 to vector<32x128xi32>
    %86 = arith.addi %75, %85 : vector<32x128xi32>
    %87 = arith.select %84, %86, %75 : vector<32x128xi1>, vector<32x128xi32>
    %c1_36 = arith.constant 1 : index
    %c0_37 = arith.constant 0 : index
    %c0_38 = arith.constant 0 : index
    %88 = vector.load %arg2[%c1_36, %c0_37, %c0_38] : memref<3x128x128xf32, #tpu.memory_space<vmem>>, vector<1x128x128xf32>
    %89 = vector.shape_cast %88 : vector<1x128x128xf32> to vector<128x128xf32>
    %cst_39 = arith.constant dense<0.000000e+00> : vector<32x128xf32>
    %90 = tpu.matmul %70, %89, %cst_39 {dimension_numbers = #tpu.dot_dimension_numbers<[1], [0], [0], [1], [0, 0, 1, 1], [], []>} : vector<32x128xf32>, vector<128x128xf32>, vector<32x128xf32> -> vector<32x128xf32>
    %c1_i32_40 = arith.constant 1 : i32
    %91 = vector.broadcast %c1_i32_40 : i32 to vector<32x128xi32>
    %92 = arith.cmpi sge, %87, %91 : vector<32x128xi32>
    %93 = vector.extract_strided_slice %70 {offsets = [31, 0], sizes = [1, 128], strides = [1, 1]} : vector<32x128xf32> to vector<1x128xf32>
    %94 = vector.extract_strided_slice %70 {offsets = [0, 0], sizes = [31, 128], strides = [1, 1]} : vector<32x128xf32> to vector<31x128xf32>
    %95 = tpu.concatenate %93, %94 in 0 : vector<1x128xf32>, vector<31x128xf32> -> vector<32x128xf32>
    %cst_41 = arith.constant 0.000000e+00 : f32
    %96 = vector.broadcast %cst_41 : f32 to vector<32x128xf32>
    %97 = arith.select %92, %95, %96 : vector<32x128xi1>, vector<32x128xf32>
    %c0_42 = arith.constant 0 : index
    %c0_43 = arith.constant 0 : index
    %c0_44 = arith.constant 0 : index
    %98 = vector.load %arg2[%c0_42, %c0_43, %c0_44] : memref<3x128x128xf32, #tpu.memory_space<vmem>>, vector<1x128x128xf32>
    %99 = vector.shape_cast %98 : vector<1x128x128xf32> to vector<128x128xf32>
    %cst_45 = arith.constant dense<0.000000e+00> : vector<32x128xf32>
    %100 = tpu.matmul %97, %99, %cst_45 {dimension_numbers = #tpu.dot_dimension_numbers<[1], [0], [0], [1], [0, 0, 1, 1], [], []>} : vector<32x128xf32>, vector<128x128xf32>, vector<32x128xf32> -> vector<32x128xf32>
    %101 = arith.addf %90, %100 : vector<32x128xf32>
    %c14_i32_46 = arith.constant 14 : i32
    %102 = vector.broadcast %c14_i32_46 : i32 to vector<32x128xi32>
    %103 = arith.cmpi sle, %87, %102 : vector<32x128xi32>
    %104 = vector.extract_strided_slice %70 {offsets = [1, 0], sizes = [31, 128], strides = [1, 1]} : vector<32x128xf32> to vector<31x128xf32>
    %105 = vector.extract_strided_slice %70 {offsets = [0, 0], sizes = [1, 128], strides = [1, 1]} : vector<32x128xf32> to vector<1x128xf32>
    %106 = tpu.concatenate %104, %105 in 0 : vector<31x128xf32>, vector<1x128xf32> -> vector<32x128xf32>
    %cst_47 = arith.constant 0.000000e+00 : f32
    %107 = vector.broadcast %cst_47 : f32 to vector<32x128xf32>
    %108 = arith.select %103, %106, %107 : vector<32x128xi1>, vector<32x128xf32>
    %c2_48 = arith.constant 2 : index
    %c0_49 = arith.constant 0 : index
    %c0_50 = arith.constant 0 : index
    %109 = vector.load %arg2[%c2_48, %c0_49, %c0_50] : memref<3x128x128xf32, #tpu.memory_space<vmem>>, vector<1x128x128xf32>
    %110 = vector.shape_cast %109 : vector<1x128x128xf32> to vector<128x128xf32>
    %cst_51 = arith.constant dense<0.000000e+00> : vector<32x128xf32>
    %111 = tpu.matmul %108, %110, %cst_51 {dimension_numbers = #tpu.dot_dimension_numbers<[1], [0], [0], [1], [0, 0, 1, 1], [], []>} : vector<32x128xf32>, vector<128x128xf32>, vector<32x128xf32> -> vector<32x128xf32>
    %112 = arith.addf %101, %111 : vector<32x128xf32>
    %c0_52 = arith.constant 0 : index
    %c0_53 = arith.constant 0 : index
    %113 = vector.load %arg5[%c0_52, %c0_53] : memref<1x128xf32, #tpu.memory_space<vmem>>, vector<1x128xf32>
    %c0_54 = arith.constant 0 : index
    %c0_55 = arith.constant 0 : index
    %114 = vector.load %arg6[%c0_54, %c0_55] : memref<1x128xf32, #tpu.memory_space<vmem>>, vector<1x128xf32>
    %cst_56 = arith.constant dense<0.000000e+00> : vector<128xf32>
    %115 = vector.multi_reduction <add>, %112, %cst_56 [0] : vector<32x128xf32> to vector<128xf32>
    %116 = vector.shape_cast %115 : vector<128xf32> to vector<1x128xf32>
    %117 = arith.mulf %112, %112 : vector<32x128xf32>
    %cst_57 = arith.constant dense<0.000000e+00> : vector<128xf32>
    %118 = vector.multi_reduction <add>, %117, %cst_57 [0] : vector<32x128xf32> to vector<128xf32>
    %119 = vector.shape_cast %118 : vector<128xf32> to vector<1x128xf32>
    %cst_58 = arith.constant dense<0.000000e+00> : vector<1x128xf32>
    %120 = tpu.matmul %116, %0, %cst_58 {dimension_numbers = #tpu.dot_dimension_numbers<[1], [0], [0], [1], [0, 0, 1, 1], [], []>} : vector<1x128xf32>, vector<128x128xf32>, vector<1x128xf32> -> vector<1x128xf32>
    %cst_59 = arith.constant 0.001953125 : f32
    %121 = vector.broadcast %cst_59 : f32 to vector<1x128xf32>
    %122 = arith.mulf %120, %121 : vector<1x128xf32>
    %cst_60 = arith.constant dense<0.000000e+00> : vector<1x128xf32>
    %123 = tpu.matmul %119, %0, %cst_60 {dimension_numbers = #tpu.dot_dimension_numbers<[1], [0], [0], [1], [0, 0, 1, 1], [], []>} : vector<1x128xf32>, vector<128x128xf32>, vector<1x128xf32> -> vector<1x128xf32>
    %cst_61 = arith.constant 0.001953125 : f32
    %124 = vector.broadcast %cst_61 : f32 to vector<1x128xf32>
    %125 = arith.mulf %123, %124 : vector<1x128xf32>
    %126 = arith.mulf %122, %122 : vector<1x128xf32>
    %127 = arith.subf %125, %126 : vector<1x128xf32>
    %cst_62 = arith.constant 9.99999974E-6 : f32
    %128 = vector.broadcast %cst_62 : f32 to vector<1x128xf32>
    %129 = arith.addf %127, %128 : vector<1x128xf32>
    %130 = math.rsqrt %129 : vector<1x128xf32>
    %131 = arith.mulf %130, %113 : vector<1x128xf32>
    %132 = arith.mulf %122, %131 : vector<1x128xf32>
    %133 = arith.subf %114, %132 : vector<1x128xf32>
    %134 = vector.broadcast %131 : vector<1x128xf32> to vector<32x128xf32>
    %135 = arith.mulf %112, %134 : vector<32x128xf32>
    %136 = vector.broadcast %133 : vector<1x128xf32> to vector<32x128xf32>
    %137 = arith.addf %135, %136 : vector<32x128xf32>
    %cst_63 = arith.constant 0.000000e+00 : f32
    %138 = vector.broadcast %cst_63 : f32 to vector<32x128xf32>
    %139 = arith.maximumf %137, %138 : vector<32x128xf32>
    %c0_64 = arith.constant 0 : index
    %c0_65 = arith.constant 0 : index
    %140 = vector.load %arg8[%c0_64, %c0_65] : memref<32x128xf32, #tpu.memory_space<vmem>>, vector<32x128xf32>
    tpu.vector_store %arg8[%c0_64, %c0_65], %139 {strides = array<i32>} : memref<32x128xf32, #tpu.memory_space<vmem>>, vector<32x128xf32>,
    return
  }
}

</mosaic_0001>

<bundles_post_ra>
// kernel: tpu_custom_call.1
= control target key start
LH: loop header
LB: loop body
LE: loop exit
PB: predicated region body
PF: predicated region fallthrough
CT: control target
= control target key end

     0   :  { %13 = vsyncpa [#allocation3], 0  ;;  %s2314_s0 = inlined_call_operand.hbm [shape: f32[32,64], index: 0, kind: input, shape index: {}]   ;;  %s2315_s1 = inlined_call_operand.hbm [shape: f32[3,64,128], index: 1, kind: input, shape index: {}]   ;;  %s2316_s2 = inlined_call_operand.hbm [shape: f32[3,128,128], index: 2, kind: input, shape index: {}]   ;;  %s2317_s3 = inlined_call_operand.vmem [shape: f32[1,128], index: 3, kind: input, shape index: {}]   ;;  %s2318_s4 = inlined_call_operand.vmem [shape: f32[1,128], index: 4, kind: input, shape index: {}]   ;;  %s2319_s5 = inlined_call_operand.vmem [shape: f32[1,128], index: 5, kind: input, shape index: {}]   ;;  %s2320_s6 = inlined_call_operand.vmem [shape: f32[1,128], index: 6, kind: input, shape index: {}]   ;;  %s2321_s7 = inlined_call_operand.hbm [shape: f32[128,128], index: 7, kind: input, shape index: {}]   ;;  %s2322_s8 = inlined_call_operand.hbm [shape: f32[32,128], index: 8, kind: output, shape index: {}]  }
   0x1   :  { %14 = vsyncpa [#allocation6], 0 }
   0x2   :  { %15 = vsyncpa [#allocation9], 0 }
   0x3   :  { %16 = vsyncpa [#allocation4], 0  ;;  %s1905_s27 = smov [#allocation5]   ;;  %s1906_s29 = smov [#allocation2]  }
   0x4   :  { %s34_s28 = sshll.u32 %s1905_s27, 4  ;;  %s22_s30 = sshll.u32 %s1906_s29, 4  ;;  %s35_s28 = int_to_ptr.vmem [resolvable:$true] %s34_s28  ;;  %s23_s30 = int_to_ptr.vmem [resolvable:$true] %s22_s30 }
   0x5   :  { %s1805_s9 = scalar_lea.vmem %s35_s28, 3072  ;;  %p1810_p1 = scmp.lt.s32.totalorder %s35_s28, %s35_s28 }
   0x6   :  { %p1806_p0 = scmp.ne.s32.totalorder %s35_s28, %s1805_s9  ;;  %p1811_p2 = scmp.lt.s32.totalorder %s1805_s9, %s1805_s9 }
   0x8   :  { %p1812_p3 = por %p1811_p2, %p1810_p1 }
   0xa   :  { %p1813_p4 = pnand %p1812_p3, %p1806_p0 }
   0xc   :  { %1816 = shalt.err (!%p1813_p4)
}
   0xd   :  { %s1907_s10 = smov 128   ;;  %s1908_s11 = smov 8  }
   0xe   :  { %40 = dma.hbm_to_vmem [thread:$0]  %s2315_s1, 3072, %s35_s28, [#allocation6], %s1907_s10, %s1907_s10, %s1908_s11  }
   0xf   :  { %s1825_s14 = scalar_lea.vmem %s23_s30, 512  ;;  %p1830_p6 = scmp.lt.s32.totalorder %s23_s30, %s23_s30 }
  0x10   :  { %p1826_p5 = scmp.ne.s32.totalorder %s23_s30, %s1825_s14  ;;  %p1831_p7 = scmp.lt.s32.totalorder %s1825_s14, %s1825_s14 }
  0x12   :  { %p1832_p8 = por %p1831_p7, %p1830_p6 }
  0x14   :  { %p1833_p9 = pnand %p1832_p8, %p1826_p5 }
  0x16   :  { %1836 = shalt.err (!%p1833_p9)
}
  0x17   :  { %28 = dma.hbm_to_vmem [thread:$0]  %s2314_s0, 512, %s23_s30, [#allocation3], %s1907_s10, %s1907_s10, %s1908_s11  }
  0x18   :  { %s1909_s17 = smov [#allocation7]   ;;  %s1910_s19 = smov [#allocation8]  }
  0x19   :  { %s46_s18 = sshll.u32 %s1909_s17, 4  ;;  %s66_s20 = sshll.u32 %s1910_s19, 4  ;;  %s47_s18 = int_to_ptr.vmem [resolvable:$true] %s46_s18  ;;  %s67_s20 = int_to_ptr.vmem [resolvable:$true] %s66_s20 }
  0x1a   :  { %s1845_s1 = scalar_lea.vmem %s47_s18, 6144  ;;  %p1850_p11 = scmp.lt.s32.totalorder %s47_s18, %s47_s18 }
  0x1b   :  { %p1846_p10 = scmp.ne.s32.totalorder %s47_s18, %s1845_s1  ;;  %p1851_p12 = scmp.lt.s32.totalorder %s1845_s1, %s1845_s1 }
  0x1d   :  { %p1852_p13 = por %p1851_p12, %p1850_p11 }
  0x1f   :  { %p1853_p0 = pnand %p1852_p13, %p1846_p10 }
  0x21   :  { %1856 = shalt.err (!%p1853_p0)
}
  0x22   :  { %52 = dma.hbm_to_vmem [thread:$0]  %s2316_s2, 6144, %s47_s18, [#allocation6], %s1907_s10, %s1907_s10, %s1908_s11  }
  0x23   :  { %s1865_s0 = scalar_lea.vmem %s67_s20, 2048  ;;  %p1870_p2 = scmp.lt.s32.totalorder %s67_s20, %s67_s20 }
  0x24   :  { %p1866_p1 = scmp.ne.s32.totalorder %s67_s20, %s1865_s0  ;;  %p1871_p3 = scmp.lt.s32.totalorder %s1865_s0, %s1865_s0 }
  0x26   :  { %p1872_p4 = por %p1871_p3, %p1870_p2 }
  0x28   :  { %p1873_p5 = pnand %p1872_p4, %p1866_p1 }
  0x2a   :  { %1876 = shalt.err (!%p1873_p5)
}
  0x2b   :  { %72 = dma.hbm_to_vmem [thread:$0]  %s2321_s7, 2048, %s67_s20, [#allocation9], %s1907_s10, %s1907_s10, %s1908_s11  }
  0x2c   :  { %1897 = dma.done.wait [#allocation3], 512  }
  0x2d   :  { %1898 = vsyncadd [#allocation3], 4294966784 }
  0x2e   :  { %1899 = dma.done.wait [#allocation6], 9216  }
  0x2f   :  { %1900 = vsyncadd [#allocation6], 4294958080 }
  0x30   :  { %1901 = dma.done.wait [#allocation9], 2048  }
  0x31   :  { %1902 = vsyncadd [#allocation9], 4294965248  ;;  %v105_v0 = vlaneseq  ;;  %v200_v1 = vld [vmem:[#allocation5 + $0x38] sm:$0xff]  ;;  %v199_v3 = vld [vmem:[#allocation5 + $0x30] sm:$0xff]  ;;  %vm177_vm0 = vcmask 1040384   ;;  %vm201_vm2 = vcmask 523264  }
  0x32   :  { %v166_v2 = vld [vmem:[#allocation5 + $0x78] sm:$0xff]  ;;  %1464 = vmatprep.subr.mxu0 %v200_v1  ;;  %v165_v4 = vld [vmem:[#allocation5 + $0x70] sm:$0xff]  ;;  %v198_v5 = vld [vmem:[#allocation5 + $0x28] sm:$0xff]  ;;  %vm396_vm4 = vcmask 1046528   ;;  %v1911_v61 = vmov 0.0   ;;  %vm1912_vm7 = vmmov 0  }
  0x33   :  { %1486 = vmatprep.subr.mxu1 %v166_v2  ;;  %1465 = vmatpush3.msra.mxu0 %v200_v1  ;;  %v164_v6 = vld [vmem:[#allocation5 + $0x68] sm:$0xff]  ;;  %v1983_v7 = vshrl.u32 %v105_v0, 7  ;;  %v197_v8 = vld [vmem:[#allocation5 + $0x20] sm:$0xff]  ;;  %v1987_v11 = vld [vmem:[#allocation2 + $0x18] sm:$0xff]  ;;  %s1913_s29 = smov [#allocation10]  }
  0x34   :  { %1487 = vmatpush3.msra.mxu1 %v166_v2  ;;  %1466 = vmatprep.subr.mxu0 %v199_v3  ;;  %v163_v9 = vld [vmem:[#allocation5 + $0x60] sm:$0xff]  ;;  %v196_v13 = vld [vmem:[#allocation5 + $0x18] sm:$0xff]  ;;  %v172_v16 = vrot.slane %v1987_v11, 7  ;;  %v195_v18 = vld [vmem:[#allocation5 + $0x10] sm:$0xff]  ;;  %v402_v53 = vrot.slane %v1987_v11, 1  ;;  %s1270_s30 = sshll.u32 %s1913_s29, 4  ;;  %s1271_s30 = int_to_ptr.vmem [resolvable:$true] %s1270_s30 }
  0x35   :  { %1488 = vmatprep.subr.mxu1 %v165_v4  ;;  %1467 = vmatpush3.msra.mxu0 %v199_v3  ;;  %v1985_v10 = vld [vmem:[#allocation2] sm:$0xff]  ;;  %v108_v12 = vadd.s32 16, %v1983_v7  ;;  %v162_v14 = vld [vmem:[#allocation5 + $0x58] sm:$0xff]  ;;  %v114_v15 = vand.u32 15, %v1983_v7  ;;  %v161_v19 = vld [vmem:[#allocation5 + $0x50] sm:$0xff]  ;;  %v107_v43 = vadd.s32 8, %v1983_v7  ;;  %p1882_p7 = scmp.lt.s32.totalorder %s1271_s30, %s1271_s30 }
  0x36   :  { %1489 = vmatpush3.msra.mxu1 %v165_v4  ;;  %1468 = vmatprep.subr.mxu0 %v198_v5  ;;  %v178_v17 = vrot.slane %v1985_v10, 7  ;;  %v1993_v20 = vld [vmem:[#allocation2 + $0x8] sm:$0xff]  ;;  %v1995_v21 = vld [vmem:[#allocation2 + $0x10] sm:$0xff]  ;;  %v193_v29 = vld [vmem:[#allocation5] sm:$0xff]  ;;  %v397_v37 = vrot.slane %v1985_v10, 1  ;;  %v109_v48 = vadd.s32 24, %v1983_v7 }
  0x37   :  { %1490 = vmatprep.subr.mxu1 %v164_v6  ;;  %1469 = vmatpush3.msra.mxu0 %v198_v5  ;;  %v128_v22 = vand.u32 15, %v108_v12  ;;  %v181_v23 = vrot.slane %v1995_v21, 7  ;;  %v194_v24 = vld [vmem:[#allocation5 + $0x8] sm:$0xff]  ;;  %vm1998_vm1 = vcmp.ge.s32.totalorder %v114_v15, 1  ;;  %v179_v28 = vrot.slane %v1993_v20, 7  ;;  %v159_v30 = vld [vmem:[#allocation5 + $0x40] sm:$0xff] }
  0x38   :  { %1491 = vmatpush3.msra.mxu1 %v164_v6  ;;  %1470 = vmatprep.subr.mxu0 %v197_v8  ;;  %v160_v25 = vld [vmem:[#allocation5 + $0x48] sm:$0xff]  ;;  %v188_v27 = vsel %vm177_vm0, %v172_v16, %v178_v17  ;;  %v422_v35 = vld [vmem:[#allocation5 + $0xb8] sm:$0xff]  ;;  %v398_v38 = vrot.slane %v1993_v20, 1  ;;  %v421_v39 = vld [vmem:[#allocation5 + $0xb0] sm:$0xff]  ;;  %v400_v46 = vrot.slane %v1995_v21, 1  ;;  %v121_v47 = vand.u32 15, %v107_v43 }
  0x39   :  { %1492 = vmatprep.subr.mxu1 %v163_v9  ;;  %1471 = vmatpush3.msra.mxu0 %v197_v8  ;;  %v189_v31 = vsel %vm1998_vm1, %v188_v27, 0.0  ;;  %vm2006_vm3 = vcmp.ge.s32.totalorder %v128_v22, 1  ;;  %v182_v33 = vsel %vm177_vm0, %v179_v28, %v181_v23  ;;  %v180_v34 = vsel %vm177_vm0, %v178_v17, %v179_v28  ;;  %v420_v40 = vld [vmem:[#allocation5 + $0xa8] sm:$0xff]  ;;  %v419_v44 = vld [vmem:[#allocation5 + $0xa0] sm:$0xff]  ;;  %v418_v45 = vld [vmem:[#allocation5 + $0x98] sm:$0xff] }
  0x3a   :  { %1493 = vmatpush3.msra.mxu1 %v163_v9  ;;  %1472 = vmatprep.subr.mxu0 %v196_v13  ;;  %v191_v36 = vsel %vm2006_vm3, %v182_v33, 0.0  ;;  %v183_v41 = vsel %vm177_vm0, %v181_v23, %v172_v16  ;;  %v399_v42 = vsel %vm396_vm4, %v397_v37, %v398_v38  ;;  %v417_v49 = vld [vmem:[#allocation5 + $0x90] sm:$0xff]  ;;  %v416_v50 = vld [vmem:[#allocation5 + $0x88] sm:$0xff]  ;;  %vm2034_vm5 = vcmp.le.s32.totalorder %v121_v47, 14  ;;  %v415_v55 = vld [vmem:[#allocation5 + $0x80] sm:$0xff] }
  0x3b   :  { %1494 = vmatprep.subr.mxu1 %v162_v14  ;;  %1473 = vmatpush3.msra.mxu0 %v196_v13  ;;  %v401_v52 = vsel %vm396_vm4, %v398_v38, %v400_v46  ;;  %v135_v54 = vand.u32 15, %v109_v48  ;;  %v403_v57 = vsel %vm396_vm4, %v400_v46, %v402_v53  ;;  %v409_v59 = vsel %vm396_vm4, %v402_v53, %v397_v37  ;;  %v2055_v62 = vld [vmem:[#allocation8 + $0x78] sm:$0xff]  ;;  %v2060_v63 = vld [vmem:[#allocation8 + $0x70] sm:$0xff]  ;;  %v2063_v0 = vld [vmem:[#allocation8 + $0x68] sm:$0xff] }
  0x3c   :  { %1495 = vmatpush3.msra.mxu1 %v162_v14  ;;  %1474 = vmatprep.subr.mxu0 %v195_v18  ;;  %v411_v56 = vsel %vm2034_vm5, %v401_v52, 0.0  ;;  %v2073_v1 = vld [vmem:[#allocation8 + $0x60] sm:$0xff]  ;;  %v2078_v2 = vld [vmem:[#allocation8 + $0x58] sm:$0xff]  ;;  %v2084_v3 = vld [vmem:[#allocation8 + $0x50] sm:$0xff] }
  0x3d   :  { %1496 = vmatprep.subr.mxu1 %v161_v19  ;;  %1475 = vmatpush3.msra.mxu0 %v195_v18  ;;  %vm2043_vm6 = vcmp.le.s32.totalorder %v135_v54, 14  ;;  %v2090_v4 = vld [vmem:[#allocation8 + $0x48] sm:$0xff]  ;;  %v2096_v5 = vld [vmem:[#allocation8 + $0x40] sm:$0xff]  ;;  %v2102_v6 = vld [vmem:[#allocation8 + $0x38] sm:$0xff] }
  0x3e   :  { %1497 = vmatpush3.msra.mxu1 %v161_v19  ;;  %1476 = vmatprep.subr.mxu0 %v194_v24  ;;  %v413_v60 = vsel %vm2043_vm6, %v409_v59, 0.0  ;;  %v2108_v8 = vld [vmem:[#allocation8 + $0x30] sm:$0xff]  ;;  %v2114_v9 = vld [vmem:[#allocation8 + $0x28] sm:$0xff]  ;;  %v2141_v14 = vld [vmem:[#allocation8] sm:$0xff] }
  0x3f   :  { %1498 = vmatprep.subr.mxu1 %v160_v25  ;;  %1477 = vmatpush3.msra.mxu0 %v194_v24  ;;  %v2132_v12 = vld [vmem:[#allocation8 + $0x10] sm:$0xff]  ;;  %v2138_v13 = vld [vmem:[#allocation8 + $0x8] sm:$0xff]  ;;  %v972_v32 = vld [vmem:[#allocation7 + $0x158] sm:$0xff] }
  0x40   :  { %1499 = vmatpush3.msra.mxu1 %v160_v25  ;;  %1478 = vmatprep.subr.mxu0 %v193_v29 }
  0x41   :  { %1500 = vmatprep.subr.mxu1 %v159_v30  ;;  %1479 = vmatpush3.msra.mxu0 %v193_v29 }
  0x42   :  { %1480 = vmatprep.mubr.msk.f32.mxu0 %vm201_vm2, %v189_v31  ;;  %1501 = vmatpush3.msra.mxu1 %v159_v30 }
  0x43   :  { %1502 = vmatprep.mubr.msk.f32.mxu1 %vm201_vm2, %v1985_v10  ;;  %1481 = vmatmul.mubr.msk.f32.vlgmr.msra.gmra.mxu0 %vm201_vm2, %v180_v34  ;;  %v2120_v10 = vld [vmem:[#allocation8 + $0x20] sm:$0xff] }
  0x44   :  { %1503 = vmatmul.mubr.msk.f32.vlgmr.msra.gmra.mxu1 %vm201_vm2, %v1993_v20  ;;  %1508 = vmatprep.subr.mxu0 %v422_v35 }
  0x45   :  { %1483 = vmatprep.mubr.msk.f32.mxu0 %vm201_vm2, %v191_v36  ;;  %1509 = vmatpush3.msra.mxu0 %v422_v35 }
  0x46   :  { %1505 = vmatprep.mubr.msk.f32.mxu1 %vm201_vm2, %v1995_v21  ;;  %1510 = vmatprep.subr.mxu0 %v421_v39 }
  0x47   :  { %1511 = vmatpush3.msra.mxu0 %v421_v39  ;;  %1530 = vmatprep.subr.mxu1 %v1911_v61 }
  0x48   :  { %1506 = vmatmul.mubr.msk.f32.gmra.mxu1 %vm201_vm2, %v1987_v11  ;;  %1512 = vmatprep.subr.mxu0 %v420_v40  ;;  %v2126_v11 = vld [vmem:[#allocation8 + $0x18] sm:$0xff] }
  0x49   :  { %1484 = vmatmul.mubr.msk.f32.gmra.mxu0 %vm201_vm2, %v183_v41  ;;  %1531 = vmatpush3.msra.mxu1 %v2055_v62 }
  0x4a   :  { %1513 = vmatpush3.msra.mxu0 %v420_v40  ;;  %1524 = vmatprep.mubr.msk.f32.mxu0 %vm201_vm2, %v399_v42 }
  0x4b   :  { %1514 = vmatprep.subr.mxu0 %v419_v44  ;;  %1532 = vmatprep.subr.mxu1 %v1911_v61 }
  0x4c   :  { %1515 = vmatpush3.msra.mxu0 %v419_v44  ;;  %1533 = vmatpush3.msra.mxu1 %v2060_v63 }
  0x4d   :  { %1516 = vmatprep.subr.mxu0 %v418_v45  ;;  %1534 = vmatprep.subr.mxu1 %v1911_v61 }
  0x4e   :  { %1517 = vmatpush3.msra.mxu0 %v418_v45  ;;  %1535 = vmatpush3.msra.mxu1 %v2063_v0 }
  0x4f   :  { %1518 = vmatprep.subr.mxu0 %v417_v49  ;;  %1536 = vmatprep.subr.mxu1 %v1911_v61 }
  0x50   :  { %1519 = vmatpush3.msra.mxu0 %v417_v49  ;;  %1537 = vmatpush3.msra.mxu1 %v2073_v1 }
  0x51   :  { %1520 = vmatprep.subr.mxu0 %v416_v50  ;;  %1538 = vmatprep.subr.mxu1 %v1911_v61 }
  0x52   :  { %1521 = vmatpush3.msra.mxu0 %v416_v50  ;;  %1539 = vmatpush3.msra.mxu1 %v2078_v2 }
  0x53   :  { %1522 = vmatprep.subr.mxu0 %v415_v55  ;;  %1540 = vmatprep.subr.mxu1 %v1911_v61 }
  0x54   :  { %1523 = vmatpush3.msra.mxu0 %v415_v55  ;;  %1541 = vmatpush3.msra.mxu1 %v2084_v3 }
  0x55   :  { %1525 = vmatmul.mubr.msk.f32.vlgmr.msra.gmra.mxu0 %vm201_vm2, %v411_v56  ;;  %1565 = vmatprep.subr.mxu0 %v1911_v61 }
  0x56   :  { %1527 = vmatprep.mubr.msk.f32.mxu0 %vm201_vm2, %v403_v57  ;;  %1566 = vmatpush3.msra.mxu0 %v2055_v62 }
  0x57   :  { %1567 = vmatprep.subr.mxu0 %v1911_v61  ;;  %1542 = vmatprep.subr.mxu1 %v1911_v61 }
  0x58   :  { %1568 = vmatpush3.msra.mxu0 %v2060_v63  ;;  %1543 = vmatpush3.msra.mxu1 %v2090_v4 }
  0x59   :  { %1528 = vmatmul.mubr.msk.f32.gmra.mxu0 %vm201_vm2, %v413_v60  ;;  %1569 = vmatprep.subr.mxu0 %v1911_v61 }
  0x5a   :  { %1570 = vmatpush3.msra.mxu0 %v2063_v0  ;;  %1544 = vmatprep.subr.mxu1 %v1911_v61 }
  0x5b   :  { %1571 = vmatprep.subr.mxu0 %v1911_v61  ;;  %1545 = vmatpush3.msra.mxu1 %v2096_v5 }
  0x5c   :  { %1572 = vmatpush3.msra.mxu0 %v2073_v1  ;;  %1546 = vmatprep.subr.mxu1 %v1911_v61 }
  0x5d   :  { %1573 = vmatprep.subr.mxu0 %v1911_v61  ;;  %1547 = vmatpush3.msra.mxu1 %v2102_v6 }
  0x5e   :  { %1574 = vmatpush3.msra.mxu0 %v2078_v2  ;;  %1548 = vmatprep.subr.mxu1 %v1911_v61 }
  0x5f   :  { %1575 = vmatprep.subr.mxu0 %v1911_v61  ;;  %1549 = vmatpush3.msra.mxu1 %v2108_v8 }
  0x60   :  { %1576 = vmatpush3.msra.mxu0 %v2084_v3  ;;  %1550 = vmatprep.subr.mxu1 %v1911_v61 }
  0x61   :  { %1577 = vmatprep.subr.mxu0 %v1911_v61  ;;  %1551 = vmatpush3.msra.mxu1 %v2114_v9 }
  0x62   :  { %1578 = vmatpush3.msra.mxu0 %v2090_v4  ;;  %1552 = vmatprep.subr.mxu1 %v1911_v61 }
  0x63   :  { %1579 = vmatprep.subr.mxu0 %v1911_v61  ;;  %1553 = vmatpush3.msra.mxu1 %v2120_v10 }
  0x64   :  { %1580 = vmatpush3.msra.mxu0 %v2096_v5  ;;  %1554 = vmatprep.subr.mxu1 %v1911_v61 }
  0x65   :  { %1581 = vmatprep.subr.mxu0 %v1911_v61  ;;  %1555 = vmatpush3.msra.mxu1 %v2126_v11 }
  0x66   :  { %1582 = vmatpush3.msra.mxu0 %v2102_v6  ;;  %1556 = vmatprep.subr.mxu1 %v1911_v61 }
  0x67   :  { %1583 = vmatprep.subr.mxu0 %v1911_v61  ;;  %1557 = vmatpush3.msra.mxu1 %v2132_v12 }
  0x68   :  { %1584 = vmatpush3.msra.mxu0 %v2108_v8  ;;  %1558 = vmatprep.subr.mxu1 %v1911_v61 }
  0x69   :  { %1585 = vmatprep.subr.mxu0 %v1911_v61  ;;  %1559 = vmatpush3.msra.mxu1 %v2138_v13 }
  0x6a   :  { %1586 = vmatpush3.msra.mxu0 %v2114_v9  ;;  %1562 = vmatprep.mubr.msk.f32.mxu1 %vm1912_vm7, %v1911_v61 }
  0x6b   :  { %1587 = vmatprep.subr.mxu0 %v1911_v61  ;;  %1560 = vmatprep.subr.mxu1 %v1911_v61 }
  0x6c   :  { %1588 = vmatpush3.msra.mxu0 %v2120_v10  ;;  %1561 = vmatpush3.msra.mxu1 %v2141_v14 }
  0x6d   :  { %1589 = vmatprep.subr.mxu0 %v1911_v61  ;;  %1597 = vmatprep.mubr.msk.f32.mxu0 %vm1912_vm7, %v1911_v61 }
  0x6e   :  { %1590 = vmatpush3.msra.mxu0 %v2126_v11 }
  0x6f   :  { %1591 = vmatprep.subr.mxu0 %v1911_v61 }
  0x70   :  { %1592 = vmatpush3.msra.mxu0 %v2132_v12 }
  0x71   :  { %1593 = vmatprep.subr.mxu0 %v1911_v61 }
  0x72   :  { %1594 = vmatpush3.msra.mxu0 %v2138_v13 }
  0x73   :  { %1595 = vmatprep.subr.mxu0 %v1911_v61 }
  0x74   :  { %1596 = vmatpush3.msra.mxu0 %v2141_v14 }
 0x103   :  { %v1482_v15 = vpop.f32.mrf.mxu0 }
 0x104   :  { %v1504_v16 = vpop.f32.mrf.mxu1 }
 0x105   :  { %v280_v17 = vpop.f32.mrf.mxu0  ;;  %v379_v23 = vadd.f32 %v1504_v16, %v1482_v15  ;;  %v735_v15 = vld [vmem:[#allocation7 + $0xf8] sm:$0xff] }
 0x106   :  { %v373_v19 = vpop.f32.mrf.mxu1  ;;  %1638 = vmatprep.subr.mxu0 %v735_v15  ;;  %v772_v16 = vld [vmem:[#allocation7 + $0x78] sm:$0xff] }
 0x107   :  { %v374_v24 = vadd.f32 %v373_v19, %v280_v17  ;;  %v734_v17 = vld [vmem:[#allocation7 + $0xf0] sm:$0xff]  ;;  %1600 = vmatprep.subr.mxu1 %v772_v16  ;;  %v733_v19 = vld [vmem:[#allocation7 + $0xe8] sm:$0xff] }
 0x108   :  { %v1507_v20 = vpop.f32.mrf.mxu1 }
 0x109   :  { %v1485_v18 = vpop.f32.mrf.mxu0 }
 0x10a   :  { %v383_v25 = vpop.f32.mrf.mxu1  ;;  %v389_v31 = vadd.f32 %v1507_v20, %v1485_v18  ;;  %v771_v18 = vld [vmem:[#allocation7 + $0x70] sm:$0xff]  ;;  %v770_v20 = vld [vmem:[#allocation7 + $0x68] sm:$0xff] }
 0x10b   :  { %v290_v21 = vpop.f32.mrf.mxu0 }
 0x10c   :  { %v384_v33 = vadd.f32 %v383_v25, %v290_v21  ;;  %v732_v21 = vld [vmem:[#allocation7 + $0xe0] sm:$0xff]  ;;  %v730_v25 = vld [vmem:[#allocation7 + $0xd0] sm:$0xff] }
 0x115   :  { %v1526_v22 = vpop.f32.mrf.mxu0 }
 0x116   :  { %v2153_v28 = vadd.f32 %v1526_v22, %v379_v23  ;;  %v769_v22 = vld [vmem:[#allocation7 + $0x60] sm:$0xff]  ;;  %v731_v23 = vld [vmem:[#allocation7 + $0xd8] sm:$0xff] }
 0x117   :  { %v501_v27 = vpop.f32.mrf.mxu0 }
 0x118   :  { %v2155_v29 = vadd.f32 %v501_v27, %v374_v24  ;;  %v536_v36 = vmul.f32 %v2153_v28, %v2153_v28  ;;  %v768_v24 = vld [vmem:[#allocation7 + $0x58] sm:$0xff]  ;;  %v767_v27 = vld [vmem:[#allocation7 + $0x50] sm:$0xff] }
 0x119   :  { %v1529_v30 = vpop.f32.mrf.mxu0 }
 0x11a   :  { %v535_v34 = vmul.f32 %v2155_v29, %v2155_v29  ;;  %v526_v37 = vadd.f32 %v2153_v28, %v2155_v29  ;;  %v2163_v38 = vadd.f32 %v1529_v30, %v389_v31  ;;  %v729_v30 = vld [vmem:[#allocation7 + $0xc8] sm:$0xff] }
 0x11b   :  { %v511_v35 = vpop.f32.mrf.mxu0  ;;  %v766_v31 = vld [vmem:[#allocation7 + $0x48] sm:$0xff] }
 0x11c   :  { %v2165_v39 = vadd.f32 %v511_v35, %v384_v33  ;;  %v539_v40 = vadd.f32 %v536_v36, %v535_v34  ;;  %v538_v43 = vmul.f32 %v2163_v38, %v2163_v38  ;;  %v728_v33 = vld [vmem:[#allocation7 + $0xc0] sm:$0xff]  ;;  %v727_v35 = vld [vmem:[#allocation7 + $0xb8] sm:$0xff] }
 0x11d   :  { %v765_v34 = vld [vmem:[#allocation7 + $0x40] sm:$0xff]  ;;  %v764_v36 = vld [vmem:[#allocation7 + $0x38] sm:$0xff] }
 0x11e   :  { %v527_v41 = vadd.f32 %v526_v37, %v2165_v39  ;;  %v537_v42 = vmul.f32 %v2165_v39, %v2165_v39  ;;  %v726_v37 = vld [vmem:[#allocation7 + $0xb0] sm:$0xff] }
 0x120   :  { %v528_v44 = vadd.f32 %v527_v41, %v2163_v38  ;;  %v540_v45 = vadd.f32 %v539_v40, %v537_v42  ;;  %v763_v40 = vld [vmem:[#allocation7 + $0x30] sm:$0xff]  ;;  %v725_v41 = vld [vmem:[#allocation7 + $0xa8] sm:$0xff] }
 0x121   :  { %v762_v42 = vld [vmem:[#allocation7 + $0x28] sm:$0xff] }
 0x122   :  { %v529_v46 = vrot.slane %v528_v44, 4  ;;  %v541_v47 = vadd.f32 %v540_v45, %v538_v43  ;;  %v724_v43 = vld [vmem:[#allocation7 + $0xa0] sm:$0xff]  ;;  %v723_v45 = vld [vmem:[#allocation7 + $0x98] sm:$0xff] }
 0x124   :  { %v530_v48 = vadd.f32 %v529_v46, %v528_v44  ;;  %v542_v49 = vrot.slane %v541_v47, 4  ;;  %v761_v44 = vld [vmem:[#allocation7 + $0x20] sm:$0xff]  ;;  %v760_v46 = vld [vmem:[#allocation7 + $0x18] sm:$0xff] }
 0x126   :  { %v531_v50 = vrot.slane %v530_v48, 2  ;;  %v543_v52 = vadd.f32 %v542_v49, %v541_v47  ;;  %v722_v47 = vld [vmem:[#allocation7 + $0x90] sm:$0xff]  ;;  %v721_v49 = vld [vmem:[#allocation7 + $0x88] sm:$0xff] }
 0x128   :  { %v532_v53 = vadd.f32 %v531_v50, %v530_v48  ;;  %v544_v54 = vrot.slane %v543_v52, 2  ;;  %v759_v48 = vld [vmem:[#allocation7 + $0x10] sm:$0xff]  ;;  %v758_v50 = vld [vmem:[#allocation7 + $0x8] sm:$0xff] }
 0x12a   :  { %v533_v55 = vrot.slane %v532_v53, 1  ;;  %v545_v56 = vadd.f32 %v544_v54, %v543_v52  ;;  %v720_v52 = vld [vmem:[#allocation7 + $0x80] sm:$0xff]  ;;  %v976_v54 = vld [vmem:[#allocation7 + $0x178] sm:$0xff] }
 0x12c   :  { %v534_v57 = vadd.f32 %v533_v55, %v532_v53  ;;  %v546_v59 = vrot.slane %v545_v56, 1  ;;  %v757_v53 = vld [vmem:[#allocation7] sm:$0xff] }
 0x12e   :  { %1563 = vmatmul.mubr.f32.vlgmr.msra.gmra.mxu1 %v534_v57  ;;  %v547_v60 = vadd.f32 %v546_v59, %v545_v56 }
 0x12f   :  { %1601 = vmatpush3.msra.mxu1 %v772_v16 }
 0x130   :  { %1598 = vmatmul.mubr.f32.vlgmr.msra.gmra.mxu0 %v547_v60  ;;  %1602 = vmatprep.subr.mxu1 %v771_v18 }
 0x131   :  { %1639 = vmatpush3.msra.mxu0 %v735_v15  ;;  %1603 = vmatpush3.msra.mxu1 %v771_v18 }
 0x132   :  { %1640 = vmatprep.subr.mxu0 %v734_v17  ;;  %1604 = vmatprep.subr.mxu1 %v770_v20 }
 0x133   :  { %1641 = vmatpush3.msra.mxu0 %v734_v17  ;;  %1605 = vmatpush3.msra.mxu1 %v770_v20  ;;  %v2178_v20 = vsub.s32 0, %v1983_v7 }
 0x134   :  { %1642 = vmatprep.subr.mxu0 %v733_v19  ;;  %1606 = vmatprep.subr.mxu1 %v769_v22 }
 0x135   :  { %1643 = vmatpush3.msra.mxu0 %v733_v19  ;;  %1607 = vmatpush3.msra.mxu1 %v769_v22  ;;  %v524_v19 = vld [vmem:[%s2317_s3] sm:$0x1] }
 0x136   :  { %1644 = vmatprep.subr.mxu0 %v732_v21  ;;  %1608 = vmatprep.subr.mxu1 %v768_v24 }
 0x137   :  { %1645 = vmatpush3.msra.mxu0 %v732_v21  ;;  %1609 = vmatpush3.msra.mxu1 %v768_v24 }
 0x138   :  { %1646 = vmatprep.subr.mxu0 %v731_v23  ;;  %1610 = vmatprep.subr.mxu1 %v767_v27 }
 0x139   :  { %1647 = vmatpush3.msra.mxu0 %v731_v23  ;;  %1611 = vmatpush3.msra.mxu1 %v767_v27  ;;  %v525_v23 = vld [vmem:[%s2318_s4] sm:$0x1] }
 0x13a   :  { %1648 = vmatprep.subr.mxu0 %v730_v25  ;;  %1612 = vmatprep.subr.mxu1 %v766_v31 }
 0x13b   :  { %1649 = vmatpush3.msra.mxu0 %v730_v25  ;;  %1613 = vmatpush3.msra.mxu1 %v766_v31 }
 0x13c   :  { %1650 = vmatprep.subr.mxu0 %v729_v30  ;;  %1614 = vmatprep.subr.mxu1 %v765_v34 }
 0x13d   :  { %1651 = vmatpush3.msra.mxu0 %v729_v30  ;;  %1615 = vmatpush3.msra.mxu1 %v765_v34 }
 0x13e   :  { %1652 = vmatprep.subr.mxu0 %v728_v33  ;;  %1616 = vmatprep.subr.mxu1 %v764_v36 }
 0x13f   :  { %1653 = vmatpush3.msra.mxu0 %v728_v33  ;;  %1617 = vmatpush3.msra.mxu1 %v764_v36 }
 0x140   :  { %1654 = vmatprep.subr.mxu0 %v727_v35  ;;  %1618 = vmatprep.subr.mxu1 %v763_v40 }
 0x141   :  { %1655 = vmatpush3.msra.mxu0 %v727_v35  ;;  %1619 = vmatpush3.msra.mxu1 %v763_v40 }
 0x142   :  { %1656 = vmatprep.subr.mxu0 %v726_v37  ;;  %1620 = vmatprep.subr.mxu1 %v762_v42 }
 0x143   :  { %1657 = vmatpush3.msra.mxu0 %v726_v37  ;;  %1621 = vmatpush3.msra.mxu1 %v762_v42 }
 0x144   :  { %1658 = vmatprep.subr.mxu0 %v725_v41  ;;  %1622 = vmatprep.subr.mxu1 %v761_v44 }
 0x145   :  { %1659 = vmatpush3.msra.mxu0 %v725_v41  ;;  %1623 = vmatpush3.msra.mxu1 %v761_v44 }
 0x146   :  { %1660 = vmatprep.subr.mxu0 %v724_v43  ;;  %1624 = vmatprep.subr.mxu1 %v760_v46 }
 0x147   :  { %1661 = vmatpush3.msra.mxu0 %v724_v43  ;;  %1625 = vmatpush3.msra.mxu1 %v760_v46 }
 0x148   :  { %1662 = vmatprep.subr.mxu0 %v723_v45  ;;  %1626 = vmatprep.subr.mxu1 %v759_v48 }
 0x149   :  { %1663 = vmatpush3.msra.mxu0 %v723_v45  ;;  %1627 = vmatpush3.msra.mxu1 %v759_v48 }
 0x14a   :  { %1664 = vmatprep.subr.mxu0 %v722_v47  ;;  %1628 = vmatprep.subr.mxu1 %v758_v50 }
 0x14b   :  { %1665 = vmatpush3.msra.mxu0 %v722_v47  ;;  %1629 = vmatpush3.msra.mxu1 %v758_v50  ;;  %v975_v47 = vld [vmem:[#allocation7 + $0x170] sm:$0xff] }
 0x14c   :  { %1666 = vmatprep.subr.mxu0 %v721_v49  ;;  %1630 = vmatprep.subr.mxu1 %v757_v53 }
 0x14d   :  { %1667 = vmatpush3.msra.mxu0 %v721_v49  ;;  %1631 = vmatpush3.msra.mxu1 %v757_v53  ;;  %v973_v53 = vld [vmem:[#allocation7 + $0x160] sm:$0xff] }
 0x14e   :  { %1668 = vmatprep.subr.mxu0 %v720_v52  ;;  %1676 = vmatprep.subr.mxu1 %v976_v54 }
 0x14f   :  { %1669 = vmatpush3.msra.mxu0 %v720_v52  ;;  %v974_v52 = vld [vmem:[#allocation7 + $0x168] sm:$0xff] }
 0x150   :  { %1714 = vmatprep.subr.mxu0 %v1911_v61 }
 0x1ee   :  { %v614_v55 = vpop.f32.mrf.mxu1 }
 0x1ef   :  { %v618_v56 = vmul.f32 0.001953125, %v614_v55  ;;  %v971_v55 = vld [vmem:[#allocation7 + $0x150] sm:$0xff] }
 0x1f0   :  { %v1564_v57 = vpop.f32.mrf.mxu1  ;;  %v685_v59 = vpop.f32.mrf.mxu0 }
 0x1f1   :  { %v690_v60 = vmul.f32 %v618_v56, %v618_v56  ;;  %v689_v15 = vmul.f32 0.001953125, %v685_v59  ;;  %v969_v57 = vld [vmem:[#allocation7 + $0x140] sm:$0xff]  ;;  %v968_v59 = vld [vmem:[#allocation7 + $0x138] sm:$0xff] }
 0x1f2   :  { %v1599_v16 = vpop.f32.mrf.mxu0 }
 0x1f3   :  { %v691_v17 = vsub.f32 %v689_v15, %v690_v60  ;;  %v967_v60 = vld [vmem:[#allocation7 + $0x130] sm:$0xff]  ;;  %v966_v15 = vld [vmem:[#allocation7 + $0x128] sm:$0xff]  ;;  %v965_v16 = vld [vmem:[#allocation7 + $0x120] sm:$0xff] }
 0x1f5   :  { %v692_v18 = vadd.f32 1e-05, %v691_v17  ;;  %v964_v17 = vld [vmem:[#allocation7 + $0x118] sm:$0xff] }
 0x1f7   :  { %1793 = vrsqrt.f32 %v692_v18  ;;  %v963_v18 = vld [vmem:[#allocation7 + $0x110] sm:$0xff] }
 0x204   :  { %v1794_v21 = vpop.eup %1793 }
 0x205   :  { %v694_v22 = vmul.f32 %v1794_v21, %v524_v19  ;;  %v962_v19 = vld [vmem:[#allocation7 + $0x108] sm:$0xff] }
 0x207   :  { %v695_v24 = vmul.f32 %v694_v22, %v618_v56  ;;  %v700_v25 = vrot.slane %v694_v22, %v2178_v20  ;;  %v970_v56 = vld [vmem:[#allocation7 + $0x148] sm:$0xff]  ;;  %v961_v22 = vld [vmem:[#allocation7 + $0x100] sm:$0xff] }
 0x209   :  { %v696_v27 = vsub.f32 %v525_v23, %v695_v24  ;;  %v701_v30 = vmul.f32 %v700_v25, %v2155_v29  ;;  %v702_v33 = vmul.f32 %v700_v25, %v2153_v28  ;;  %v703_v34 = vmul.f32 %v700_v25, %v2165_v39 }
 0x20a   :  { %v704_v7 = vmul.f32 %v700_v25, %v2163_v38 }
 0x20b   :  { %v709_v31 = vrot.slane %v696_v27, %v2178_v20 }
 0x20d   :  { %v711_v35 = vadd.f32 %v709_v31, %v701_v30  ;;  %v712_v36 = vadd.f32 %v709_v31, %v702_v33  ;;  %v713_v37 = vadd.f32 %v709_v31, %v703_v34  ;;  %v714_v40 = vadd.f32 %v709_v31, %v704_v7 }
 0x20f   :  { %v2189_v41 = vmax.f32 %v711_v35, 0.0  ;;  %v2191_v42 = vmax.f32 %v712_v36, 0.0  ;;  %v2193_v43 = vmax.f32 %v713_v37, 0.0  ;;  %v2195_v44 = vmax.f32 %v714_v40, 0.0 }
 0x211   :  { %1670 = vmatprep.mubr.f32.mxu0 %v2189_v41  ;;  %v737_v28 = vrot.slane %v2195_v44, 7  ;;  %v742_v29 = vrot.slane %v2189_v41, 7  ;;  %v743_v38 = vrot.slane %v2191_v42, 7  ;;  %v745_v39 = vrot.slane %v2193_v43, 7 }
 0x212   :  { %1671 = vmatmul.mubr.f32.vlgmr.msra.gmra.mxu0 %v2191_v42  ;;  %v943_v49 = vrot.slane %v2189_v41, 1  ;;  %v944_v50 = vrot.slane %v2191_v42, 1  ;;  %v946_v21 = vrot.slane %v2193_v43, 1  ;;  %v948_v23 = vrot.slane %v2195_v44, 1 }
 0x213   :  { %1673 = vmatprep.mubr.f32.mxu0 %v2193_v43  ;;  %v752_v45 = vsel %vm177_vm0, %v737_v28, %v742_v29  ;;  %v744_v46 = vsel %vm177_vm0, %v742_v29, %v743_v38  ;;  %1715 = vmatpush3.msra.mxu0 %v2055_v62  ;;  %v746_v48 = vsel %vm177_vm0, %v743_v38, %v745_v39 }
 0x214   :  { %1632 = vmatprep.mubr.msk.f32.mxu1 %vm1998_vm1, %v752_v45  ;;  %1716 = vmatprep.subr.mxu0 %v1911_v61  ;;  %v747_v26 = vsel %vm177_vm0, %v745_v39, %v737_v28  ;;  %v947_v24 = vsel %vm396_vm4, %v944_v50, %v946_v21  ;;  %v949_v25 = vsel %vm396_vm4, %v946_v21, %v948_v23 }
 0x215   :  { %1633 = vmatmul.mubr.f32.vlgmr.msra.gmra.mxu1 %v744_v46  ;;  %1717 = vmatpush3.msra.mxu0 %v2060_v63  ;;  %v955_v27 = vsel %vm396_vm4, %v948_v23, %v943_v49 }
 0x216   :  { %1677 = vmatpush3.msra.mxu1 %v976_v54  ;;  %1635 = vmatprep.mubr.msk.f32.mxu1 %vm2006_vm3, %v746_v48  ;;  %v945_v54 = vsel %vm396_vm4, %v943_v49, %v944_v50 }
 0x217   :  { %1674 = vmatmul.mubr.f32.gmra.mxu0 %v2195_v44  ;;  %1678 = vmatprep.subr.mxu1 %v975_v47 }
 0x218   :  { %1679 = vmatpush3.msra.mxu1 %v975_v47  ;;  %1718 = vmatprep.subr.mxu0 %v1911_v61 }
 0x219   :  { %1680 = vmatprep.subr.mxu1 %v974_v52  ;;  %1636 = vmatmul.mubr.f32.gmra.mxu1 %v747_v26 }
 0x21a   :  { %1681 = vmatpush3.msra.mxu1 %v974_v52  ;;  %1708 = vmatprep.mubr.f32.mxu1 %v945_v54 }
 0x21b   :  { %1682 = vmatprep.subr.mxu1 %v973_v53  ;;  %1719 = vmatpush3.msra.mxu0 %v2063_v0 }
 0x21c   :  { %1683 = vmatpush3.msra.mxu1 %v973_v53  ;;  %1720 = vmatprep.subr.mxu0 %v1911_v61 }
 0x21d   :  { %1684 = vmatprep.subr.mxu1 %v972_v32  ;;  %1721 = vmatpush3.msra.mxu0 %v2073_v1 }
 0x21e   :  { %1685 = vmatpush3.msra.mxu1 %v972_v32  ;;  %1722 = vmatprep.subr.mxu0 %v1911_v61 }
 0x21f   :  { %1686 = vmatprep.subr.mxu1 %v971_v55  ;;  %1723 = vmatpush3.msra.mxu0 %v2078_v2 }
 0x220   :  { %1687 = vmatpush3.msra.mxu1 %v971_v55  ;;  %1724 = vmatprep.subr.mxu0 %v1911_v61 }
 0x221   :  { %1688 = vmatprep.subr.mxu1 %v970_v56  ;;  %1725 = vmatpush3.msra.mxu0 %v2084_v3 }
 0x222   :  { %1689 = vmatpush3.msra.mxu1 %v970_v56  ;;  %1726 = vmatprep.subr.mxu0 %v1911_v61 }
 0x223   :  { %1690 = vmatprep.subr.mxu1 %v969_v57  ;;  %1727 = vmatpush3.msra.mxu0 %v2090_v4 }
 0x224   :  { %1691 = vmatpush3.msra.mxu1 %v969_v57  ;;  %1728 = vmatprep.subr.mxu0 %v1911_v61 }
 0x225   :  { %1692 = vmatprep.subr.mxu1 %v968_v59  ;;  %1729 = vmatpush3.msra.mxu0 %v2096_v5 }
 0x226   :  { %1693 = vmatpush3.msra.mxu1 %v968_v59  ;;  %1730 = vmatprep.subr.mxu0 %v1911_v61 }
 0x227   :  { %1694 = vmatprep.subr.mxu1 %v967_v60  ;;  %1731 = vmatpush3.msra.mxu0 %v2102_v6 }
 0x228   :  { %1695 = vmatpush3.msra.mxu1 %v967_v60  ;;  %1732 = vmatprep.subr.mxu0 %v1911_v61  ;;  %v1066_v60 = vld [vmem:[%s2319_s5] sm:$0x1]  ;;  %s1877_s5 = scalar_lea.vmem %s1271_s30, 512 }
 0x229   :  { %1696 = vmatprep.subr.mxu1 %v966_v15  ;;  %1733 = vmatpush3.msra.mxu0 %v2108_v8  ;;  %p1878_p6 = scmp.ne.s32.totalorder %s1271_s30, %s1877_s5  ;;  %p1883_p8 = scmp.lt.s32.totalorder %s1877_s5, %s1877_s5 }
 0x22a   :  { %1697 = vmatpush3.msra.mxu1 %v966_v15  ;;  %1734 = vmatprep.subr.mxu0 %v1911_v61 }
 0x22b   :  { %1698 = vmatprep.subr.mxu1 %v965_v16  ;;  %1735 = vmatpush3.msra.mxu0 %v2114_v9  ;;  %p1884_p9 = por %p1883_p8, %p1882_p7 }
 0x22c   :  { %1699 = vmatpush3.msra.mxu1 %v965_v16  ;;  %1736 = vmatprep.subr.mxu0 %v1911_v61 }
 0x22d   :  { %1700 = vmatprep.subr.mxu1 %v964_v17  ;;  %1737 = vmatpush3.msra.mxu0 %v2120_v10  ;;  %p1885_p10 = pnand %p1884_p9, %p1878_p6 }
 0x22e   :  { %1701 = vmatpush3.msra.mxu1 %v964_v17  ;;  %1738 = vmatprep.subr.mxu0 %v1911_v61  ;;  %v1067_v17 = vld [vmem:[%s2320_s6] sm:$0x1] }
 0x22f   :  { %1702 = vmatprep.subr.mxu1 %v963_v18  ;;  %1739 = vmatpush3.msra.mxu0 %v2126_v11 }
 0x230   :  { %1703 = vmatpush3.msra.mxu1 %v963_v18  ;;  %1740 = vmatprep.subr.mxu0 %v1911_v61 }
 0x231   :  { %1704 = vmatprep.subr.mxu1 %v962_v19  ;;  %1741 = vmatpush3.msra.mxu0 %v2132_v12 }
 0x232   :  { %1705 = vmatpush3.msra.mxu1 %v962_v19  ;;  %1742 = vmatprep.subr.mxu0 %v1911_v61 }
 0x233   :  { %1706 = vmatprep.subr.mxu1 %v961_v22  ;;  %1743 = vmatpush3.msra.mxu0 %v2138_v13 }
 0x234   :  { %1707 = vmatpush3.msra.mxu1 %v961_v22  ;;  %1744 = vmatprep.subr.mxu0 %v1911_v61 }
 0x235   :  { %1709 = vmatmul.mubr.msk.f32.vlgmr.msra.gmra.mxu1 %vm2034_vm5, %v947_v24  ;;  %1749 = vmatprep.subr.mxu1 %v1911_v61 }
 0x236   :  { %1711 = vmatprep.mubr.f32.mxu1 %v949_v25  ;;  %1750 = vmatpush3.msra.mxu1 %v2055_v62 }
 0x237   :  { %1751 = vmatprep.subr.mxu1 %v1911_v61  ;;  %1745 = vmatpush3.msra.mxu0 %v2141_v14 }
 0x238   :  { %1752 = vmatpush3.msra.mxu1 %v2060_v63  ;;  %1746 = vmatprep.mubr.msk.f32.mxu0 %vm1912_vm7, %v1911_v61 }
 0x239   :  { %1712 = vmatmul.mubr.msk.f32.gmra.mxu1 %vm2043_vm6, %v955_v27  ;;  %1753 = vmatprep.subr.mxu1 %v1911_v61 }
 0x23a   :  { %1754 = vmatpush3.msra.mxu1 %v2063_v0  ;;  %1781 = vmatprep.mubr.msk.f32.mxu1 %vm1912_vm7, %v1911_v61 }
 0x23b   :  { %1755 = vmatprep.subr.mxu1 %v1911_v61 }
 0x23c   :  { %1756 = vmatpush3.msra.mxu1 %v2073_v1 }
 0x23d   :  { %1757 = vmatprep.subr.mxu1 %v1911_v61 }
 0x23e   :  { %1758 = vmatpush3.msra.mxu1 %v2078_v2 }
 0x23f   :  { %1759 = vmatprep.subr.mxu1 %v1911_v61 }
 0x240   :  { %1760 = vmatpush3.msra.mxu1 %v2084_v3 }
 0x241   :  { %1761 = vmatprep.subr.mxu1 %v1911_v61 }
 0x242   :  { %1762 = vmatpush3.msra.mxu1 %v2090_v4 }
 0x243   :  { %1763 = vmatprep.subr.mxu1 %v1911_v61 }
 0x244   :  { %1764 = vmatpush3.msra.mxu1 %v2096_v5 }
 0x245   :  { %1765 = vmatprep.subr.mxu1 %v1911_v61 }
 0x246   :  { %1766 = vmatpush3.msra.mxu1 %v2102_v6 }
 0x247   :  { %1767 = vmatprep.subr.mxu1 %v1911_v61 }
 0x248   :  { %1768 = vmatpush3.msra.mxu1 %v2108_v8 }
 0x249   :  { %1769 = vmatprep.subr.mxu1 %v1911_v61 }
 0x24a   :  { %1770 = vmatpush3.msra.mxu1 %v2114_v9 }
 0x24b   :  { %1771 = vmatprep.subr.mxu1 %v1911_v61 }
 0x24c   :  { %1772 = vmatpush3.msra.mxu1 %v2120_v10 }
 0x24d   :  { %1773 = vmatprep.subr.mxu1 %v1911_v61 }
 0x24e   :  { %1774 = vmatpush3.msra.mxu1 %v2126_v11 }
 0x24f   :  { %1775 = vmatprep.subr.mxu1 %v1911_v61 }
 0x250   :  { %1776 = vmatpush3.msra.mxu1 %v2132_v12 }
 0x251   :  { %1777 = vmatprep.subr.mxu1 %v1911_v61 }
 0x252   :  { %1778 = vmatpush3.msra.mxu1 %v2138_v13 }
 0x253   :  { %1779 = vmatprep.subr.mxu1 %v1911_v61 }
 0x254   :  { %1780 = vmatpush3.msra.mxu1 %v2141_v14 }
 0x2d2   :  { %v1672_v62 = vpop.f32.mrf.mxu0 }
 0x2d4   :  { %v924_v0 = vpop.f32.mrf.mxu0 }
 0x2d5   :  { %v1634_v51 = vpop.f32.mrf.mxu1 }
 0x2d6   :  { %v930_v4 = vadd.f32 %v1672_v62, %v1634_v51 }
 0x2d7   :  { %v839_v58 = vpop.f32.mrf.mxu1  ;;  %v1675_v2 = vpop.f32.mrf.mxu0 }
 0x2d8   :  { %v925_v5 = vadd.f32 %v924_v0, %v839_v58 }
 0x2d9   :  { %v1637_v63 = vpop.f32.mrf.mxu1  ;;  %v934_v10 = vpop.f32.mrf.mxu0 }
 0x2da   :  { %v940_v12 = vadd.f32 %v1675_v2, %v1637_v63 }
 0x2db   :  { %v849_v1 = vpop.f32.mrf.mxu1 }
 0x2dc   :  { %v935_v13 = vadd.f32 %v934_v10, %v849_v1 }
 0x2f5   :  { %v1710_v3 = vpop.f32.mrf.mxu1 }
 0x2f6   :  { %v1063_v8 = vadd.f32 %v1710_v3, %v930_v4 }
 0x2f7   :  { %v1043_v6 = vpop.f32.mrf.mxu1 }
 0x2f8   :  { %v1062_v9 = vadd.f32 %v1043_v6, %v925_v5  ;;  %v1078_v14 = vmul.f32 %v1063_v8, %v1063_v8 }
 0x2f9   :  { %v1713_v11 = vpop.f32.mrf.mxu1 }
 0x2fa   :  { %v1077_v61 = vmul.f32 %v1062_v9, %v1062_v9  ;;  %v1068_v31 = vadd.f32 %v1063_v8, %v1062_v9  ;;  %v1065_v33 = vadd.f32 %v1713_v11, %v940_v12 }
 0x2fb   :  { %v1053_v30 = vpop.f32.mrf.mxu1 }
 0x2fc   :  { %v1064_v34 = vadd.f32 %v1053_v30, %v935_v13  ;;  %v1081_v7 = vadd.f32 %v1078_v14, %v1077_v61  ;;  %v1080_v37 = vmul.f32 %v1065_v33, %v1065_v33 }
 0x2fe   :  { %v1069_v35 = vadd.f32 %v1068_v31, %v1064_v34  ;;  %v1079_v36 = vmul.f32 %v1064_v34, %v1064_v34 }
 0x300   :  { %v1070_v40 = vadd.f32 %v1069_v35, %v1065_v33  ;;  %v1082_v41 = vadd.f32 %v1081_v7, %v1079_v36 }
 0x302   :  { %v1071_v42 = vrot.slane %v1070_v40, 4  ;;  %v1083_v43 = vadd.f32 %v1082_v41, %v1080_v37 }
 0x304   :  { %v1072_v44 = vadd.f32 %v1071_v42, %v1070_v40  ;;  %v1084_v28 = vrot.slane %v1083_v43, 4 }
 0x306   :  { %v1073_v29 = vrot.slane %v1072_v44, 2  ;;  %v1085_v38 = vadd.f32 %v1084_v28, %v1083_v43 }
 0x308   :  { %v1074_v39 = vadd.f32 %v1073_v29, %v1072_v44  ;;  %v1086_v45 = vrot.slane %v1085_v38, 2 }
 0x30a   :  { %v1075_v46 = vrot.slane %v1074_v39, 1  ;;  %v1087_v47 = vadd.f32 %v1086_v45, %v1085_v38 }
 0x30c   :  { %v1076_v48 = vadd.f32 %v1075_v46, %v1074_v39  ;;  %v1088_v49 = vrot.slane %v1087_v47, 1 }
 0x30e   :  { %1747 = vmatmul.mubr.f32.vlgmr.msra.gmra.mxu0 %v1076_v48  ;;  %v1089_v50 = vadd.f32 %v1088_v49, %v1087_v47 }
 0x310   :  { %1782 = vmatmul.mubr.f32.vlgmr.msra.gmra.mxu1 %v1089_v50 }
 0x3ce   :  { %v1156_v52 = vpop.f32.mrf.mxu0 }
 0x3cf   :  { %v1160_v26 = vmul.f32 0.001953125, %v1156_v52 }
 0x3d0   :  { %v1748_v53 = vpop.f32.mrf.mxu0  ;;  %v1227_v54 = vpop.f32.mrf.mxu1 }
 0x3d1   :  { %v1232_v32 = vmul.f32 %v1160_v26, %v1160_v26  ;;  %v1231_v55 = vmul.f32 0.001953125, %v1227_v54 }
 0x3d2   :  { %v1783_v56 = vpop.f32.mrf.mxu1 }
 0x3d3   :  { %v1233_v57 = vsub.f32 %v1231_v55, %v1232_v32 }
 0x3d5   :  { %v1234_v59 = vadd.f32 1e-05, %v1233_v57 }
 0x3d7   :  { %1795 = vrsqrt.f32 %v1234_v59 }
 0x3e4   :  { %v1796_v15 = vpop.eup %1795 }
 0x3e5   :  { %v1236_v16 = vmul.f32 %v1796_v15, %v1066_v60 }
 0x3e7   :  { %v1237_v18 = vmul.f32 %v1236_v16, %v1160_v26  ;;  %v1242_v19 = vrot.slane %v1236_v16, %v2178_v20 }
 0x3e9   :  { %v1238_v21 = vsub.f32 %v1067_v17, %v1237_v18  ;;  %v1243_v22 = vmul.f32 %v1242_v19, %v1062_v9  ;;  %v1244_v23 = vmul.f32 %v1242_v19, %v1063_v8  ;;  %v1245_v24 = vmul.f32 %v1242_v19, %v1064_v34 }
 0x3ea   :  { %v1246_v25 = vmul.f32 %v1242_v19, %v1065_v33 }
 0x3eb   :  { %v1251_v27 = vrot.slane %v1238_v21, %v2178_v20 }
 0x3ed   :  { %v1253_v51 = vadd.f32 %v1251_v27, %v1243_v22  ;;  %v1254_v58 = vadd.f32 %v1251_v27, %v1244_v23  ;;  %v1255_v62 = vadd.f32 %v1251_v27, %v1245_v24  ;;  %v1256_v63 = vadd.f32 %v1251_v27, %v1246_v25 }
 0x3ef   :  { %v1257_v0 = vmax.f32 %v1253_v51, 0.0  ;;  %v1258_v1 = vmax.f32 %v1254_v58, 0.0  ;;  %v1259_v2 = vmax.f32 %v1255_v62, 0.0  ;;  %v1260_v3 = vmax.f32 %v1256_v63, 0.0 }
 0x3f1   :  { %1261 = vst [vmem:[#allocation10] sm:$0xff] %v1257_v0  ;;  %1262 = vst [vmem:[#allocation10 + $0x8] sm:$0xff] %v1258_v1 }
 0x3f2   :  { %1263 = vst [vmem:[#allocation10 + $0x10] sm:$0xff] %v1259_v2  ;;  %1264 = vst [vmem:[#allocation10 + $0x18] sm:$0xff] %v1260_v3 }
 0x3f3   :  { %1888 = shalt.err (!%p1885_p10)
}
 0x3f4   :  { %1276 = dma.vmem_to_hbm [thread:$0]  %s1271_s30, 512, %s2322_s8, [#allocation4], %s1907_s10, %s1907_s10, %s1908_s11  }
 0x3f5   :  { %1903 = dma.done.wait [#allocation4], 512  }
 0x3f6   :  { %1904 = vsyncadd [#allocation4], 4294966784 }
 0x3f7   :  { %1280 = vsyncpa [#allocation3], 1 }
 0x3f8   :  { %1281 = vsyncpa [#allocation6], 1 }
 0x3f9   :  { %1282 = vsyncpa [#allocation9], 1 }
 0x3fa   :  { %1283 = vsyncpa [#allocation4], 1 }

</bundles_post_ra>
